<compile_context>
chip_gen: v7x
topology: tpu7x:2x2x1
jax: 0.10.0
libtpu: 0.0.40
codegen_flags: <defaults>
</compile_context>

<pallas_src>
import jax
import jax.numpy as jnp
from jax import lax
from jax.experimental import pallas as pl
from jax.experimental.pallas import tpu as pltpu

_MiB = 1024 * 1024


def _logsigmoid(x):
    # numerically stable: logsigmoid(x) = min(x, 0) - log1p(exp(-|x|))
    return jnp.minimum(x, 0.0) - jnp.log1p(jnp.exp(-jnp.abs(x)))


def _round_up(x, m):
    return ((x + m - 1) // m) * m


def _vmem_capacity_bytes():
    """Per-core VMEM capacity; conservative fallback if the query fails."""
    cap = None
    try:
        cap = getattr(pltpu.get_tpu_info(), "vmem_capacity_bytes", None)
    except Exception:
        cap = None
    if not cap:
        cap = 64 * _MiB          # v7x per-TensorCore size: safe everywhere
    return int(cap)


def _pick_block_rows(batch, dim, itemsize, budget):
    """Largest batch tile whose 4 inputs x 2 pipeline buffers fit `budget`.

    Prefers multiples of 128 so the per-row dot products are produced
    lane-dense for the logsigmoid, and guarantees >= 2 blocks for batch > 128
    so both v7x TensorCores get work under dimension_semantics=("parallel",).
    """
    padded_dim = _round_up(max(dim, 1), 128)
    bytes_per_row = 4 * 2 * padded_dim * itemsize      # 4 inputs, double-buffered
    bt = max(1, budget // bytes_per_row)
    if bt >= batch:
        if batch > 128:
            bt = _round_up((batch + 1) // 2, 128)      # split for megacore
        else:
            bt = batch                                  # single full block
    elif bt >= 128:
        bt = (bt // 128) * 128                          # lane-dense logsigmoid
    else:
        bt = min(max(8, (bt // 8) * 8), batch)          # giant-D fallback
    return bt


def _make_kernel(batch, block_rows, dim):
    """Per-block kernel; all arguments are static Python ints."""
    dense = (block_rows % 128) == 0
    needs_mask = (batch % block_rows) != 0

    def row_dots(a_ref, b_ref):
        # Upcast only ONE operand (exact for bf16 -> f32); dtype promotion
        # keeps the multiply/accumulate in f32 without materializing four
        # full-tile f32 copies.
        prod = a_ref[...].astype(jnp.float32) * b_ref[...]
        if dense:
            # Tile-aligned split of the sublane axis (128 % 8 == 0): layout
            # no-op.  Reducing the lane axis gives a (bt/128, 128) lane-dense
            # result, so the transcendentals below run on dense vregs.
            prod = prod.reshape(block_rows // 128, 128, dim)
            return jnp.sum(prod, axis=2)                 # (bt/128, 128)
        return jnp.sum(prod, axis=1, keepdims=True)      # (bt, 1)

    def kernel(p1_ref, p2_ref, n1_ref, n2_ref, out_ref):
        pos = row_dots(p1_ref, p2_ref)        # dot(pos1[b], pos2[b])
        neg = row_dots(n1_ref, n2_ref)        # dot(neg1[b], neg2[b])

        ls = _logsigmoid(pos) + _logsigmoid(-neg)

        if needs_mask:
            # Ragged last block only: rows past the true batch read garbage
            # (possibly NaN/Inf after exp/log) which the select discards.
            lane_w = ls.shape[1]
            ri = (lax.broadcasted_iota(jnp.int32, ls.shape, 0) * lane_w
                  + lax.broadcasted_iota(jnp.int32, ls.shape, 1))
            ls = jnp.where(ri + pl.program_id(0) * block_rows < batch, ls, 0.0)

        # Lane-dense per-block partial sum; summed again in the wrapper.
        out_ref[...] = jnp.broadcast_to(jnp.sum(ls), out_ref.shape)

    return kernel


def logsigmoid_loss(pos1, pos2, neg1, neg2, *, block_rows=None,
                    vmem_budget_bytes=None):
    """Pallas equivalent of LogSigmoidLoss.forward for 2-D [B, D] inputs."""
    B, D = pos1.shape
    assert pos2.shape == (B, D) and neg1.shape == (B, D) and neg2.shape == (B, D)

    itemsize = jnp.dtype(pos1.dtype).itemsize
    cap = _vmem_capacity_bytes()
    big_vmem = cap >= 96 * _MiB              # v5e/v6e (128 MiB) vs v7x (64 MiB)

    if vmem_budget_bytes is None:
        vmem_budget_bytes = (20 if big_vmem else 14) * _MiB
    if block_rows is None:
        block_rows = _pick_block_rows(B, D, itemsize, vmem_budget_bytes)

    nblocks = pl.cdiv(B, block_rows)

    # vmem_limit follows the actual tile: 4 inputs x 2 pipeline buffers plus
    # headroom for the f32 products / upcasts, capped under physical VMEM.
    padded_dim = _round_up(D, 128)
    in_buf_bytes = 4 * 2 * block_rows * padded_dim * itemsize
    headroom = 4 * block_rows * padded_dim * 4 + 4 * _MiB
    limit_floor = (48 if big_vmem else 32) * _MiB
    vmem_limit = min(max(limit_floor, in_buf_bytes + headroom),
                     max(cap - 8 * _MiB, 32 * _MiB))

    row_spec = pl.BlockSpec((block_rows, D), lambda i: (i, 0))

    partials = pl.pallas_call(
        _make_kernel(B, block_rows, D),
        out_shape=jax.ShapeDtypeStruct((nblocks, 1, 128), jnp.float32),
        grid_spec=pltpu.PrefetchScalarGridSpec(
            num_scalar_prefetch=0,
            grid=(nblocks,),
            in_specs=[row_spec, row_spec, row_spec, row_spec],
            out_specs=pl.BlockSpec((1, 1, 128), lambda i: (i, 0, 0)),
        ),
        compiler_params=pltpu.CompilerParams(
            dimension_semantics=("parallel",),       # independent partial sums
            vmem_limit_bytes=int(vmem_limit),
        ),
    )(pos1, pos2, neg1, neg2)

    total = jnp.sum(partials[:, 0, 0])
    return -(total / B)


def _reference(pos1, pos2, neg1, neg2):
    pos_out = jnp.sum(pos1.astype(jnp.float32) * pos2.astype(jnp.float32), axis=1)
    neg_out = -jnp.sum(neg1.astype(jnp.float32) * neg2.astype(jnp.float32), axis=1)
    return -jnp.mean(_logsigmoid(pos_out) + _logsigmoid(neg_out))


if __name__ == "__main__":
    key = jax.random.PRNGKey(0)

    # (B, D, explicit block_rows): covers the lane-sparse single-block path,
    # the lane-dense multi-block path, a ragged (masked) last block, and the
    # adaptive block picker (including the >= 2-block megacore split).
    cases = [
        (16, 32, None),      # tiny: single full block, lane-sparse path
        (256, 64, 128),      # dense path, 2 blocks, B % block == 0 (no mask)
        (300, 64, 128),      # dense path, ragged last block (masked)
        (384, 64, None),     # adaptive blocks -> 2 blocks of 256 rows (masked)
    ]

    for B, D, br in cases:
        key, k1, k2, k3, k4 = jax.random.split(key, 5)
        pos1 = jax.random.normal(k1, (B, D), dtype=jnp.float32)
        pos2 = jax.random.normal(k2, (B, D), dtype=jnp.float32)
        neg1 = jax.random.normal(k3, (B, D), dtype=jnp.float32)
        neg2 = jax.random.normal(k4, (B, D), dtype=jnp.float32)

        loss = logsigmoid_loss(pos1, pos2, neg1, neg2, block_rows=br)
        jax.block_until_ready(loss)

        ref = _reference(pos1, pos2, neg1, neg2)
        assert jnp.allclose(loss, ref, atol=1e-5, rtol=1e-4), (B, D, br, loss, ref)

    print("KERNEL_OK")
</pallas_src>

<mosaic_0001>
module attributes {stable_mosaic.version = 11 : i64} {
  func.func @kernel(%arg0: i32, %arg1: memref<16x32xf32, #tpu.memory_space<vmem>>, %arg2: memref<16x32xf32, #tpu.memory_space<vmem>>, %arg3: memref<16x32xf32, #tpu.memory_space<vmem>>, %arg4: memref<16x32xf32, #tpu.memory_space<vmem>>, %arg5: memref<1x1x128xf32, #tpu.memory_space<vmem>>) attributes {dimension_semantics = [#tpu.dimension_semantics<parallel>], iteration_bounds = array<i64: 1>, scalar_prefetch = 0 : i64, scratch_operands = 0 : i64, tpu.core_type = #tpu.core_type<tc>, window_params = [{transform_indices = @transform_0, window_bounds = array<i64: 16, 32>}, {transform_indices = @transform_1, window_bounds = array<i64: 16, 32>}, {transform_indices = @transform_2, window_bounds = array<i64: 16, 32>}, {transform_indices = @transform_3, window_bounds = array<i64: 16, 32>}, {transform_indices = @transform_4, window_bounds = array<i64: 1, 1, 128>}]} {
    %c0 = arith.constant 0 : index
    %c0_0 = arith.constant 0 : index
    %0 = vector.load %arg1[%c0, %c0_0] : memref<16x32xf32, #tpu.memory_space<vmem>>, vector<16x32xf32>
    %c0_1 = arith.constant 0 : index
    %c0_2 = arith.constant 0 : index
    %1 = vector.load %arg2[%c0_1, %c0_2] : memref<16x32xf32, #tpu.memory_space<vmem>>, vector<16x32xf32>
    %2 = arith.mulf %0, %1 : vector<16x32xf32>
    %cst = arith.constant dense<0.000000e+00> : vector<16xf32>
    %3 = vector.multi_reduction <add>, %2, %cst [1] : vector<16x32xf32> to vector<16xf32>
    %4 = vector.shape_cast %3 : vector<16xf32> to vector<16x1xf32>
    %c0_3 = arith.constant 0 : index
    %c0_4 = arith.constant 0 : index
    %5 = vector.load %arg3[%c0_3, %c0_4] : memref<16x32xf32, #tpu.memory_space<vmem>>, vector<16x32xf32>
    %c0_5 = arith.constant 0 : index
    %c0_6 = arith.constant 0 : index
    %6 = vector.load %arg4[%c0_5, %c0_6] : memref<16x32xf32, #tpu.memory_space<vmem>>, vector<16x32xf32>
    %7 = arith.mulf %5, %6 : vector<16x32xf32>
    %cst_7 = arith.constant dense<0.000000e+00> : vector<16xf32>
    %8 = vector.multi_reduction <add>, %7, %cst_7 [1] : vector<16x32xf32> to vector<16xf32>
    %9 = vector.shape_cast %8 : vector<16xf32> to vector<16x1xf32>
    %cst_8 = arith.constant 0.000000e+00 : f32
    %10 = vector.broadcast %cst_8 : f32 to vector<16x1xf32>
    %11 = arith.minimumf %4, %10 : vector<16x1xf32>
    %12 = math.absf %4 : vector<16x1xf32>
    %cst_9 = arith.constant 0.000000e+00 : f32
    %13 = vector.broadcast %cst_9 : f32 to vector<16x1xf32>
    %14 = arith.subf %13, %12 : vector<16x1xf32>
    %15 = math.exp %14 : vector<16x1xf32>
    %16 = math.log1p %15 : vector<16x1xf32>
    %17 = arith.subf %11, %16 : vector<16x1xf32>
    %cst_10 = arith.constant 0.000000e+00 : f32
    %18 = vector.broadcast %cst_10 : f32 to vector<16x1xf32>
    %19 = arith.subf %18, %9 : vector<16x1xf32>
    %cst_11 = arith.constant 0.000000e+00 : f32
    %20 = vector.broadcast %cst_11 : f32 to vector<16x1xf32>
    %21 = arith.minimumf %19, %20 : vector<16x1xf32>
    %22 = math.absf %19 : vector<16x1xf32>
    %cst_12 = arith.constant 0.000000e+00 : f32
    %23 = vector.broadcast %cst_12 : f32 to vector<16x1xf32>
    %24 = arith.subf %23, %22 : vector<16x1xf32>
    %25 = math.exp %24 : vector<16x1xf32>
    %26 = math.log1p %25 : vector<16x1xf32>
    %27 = arith.subf %21, %26 : vector<16x1xf32>
    %28 = arith.addf %17, %27 : vector<16x1xf32>
    %29 = vector.shape_cast %28 : vector<16x1xf32> to vector<1x16x1xf32>
    %cst_13 = arith.constant dense<0.000000e+00> : vector<1xf32>
    %30 = vector.multi_reduction <add>, %29, %cst_13 [1, 2] : vector<1x16x1xf32> to vector<1xf32>
    %31 = vector.shape_cast %30 : vector<1xf32> to vector<1x1x1xf32>
    %32 = vector.extract %31[0, 0, 0] : f32 from vector<1x1x1xf32>
    %33 = vector.broadcast %32 : f32 to vector<1x1x128xf32>
    %c0_14 = arith.constant 0 : index
    %c0_15 = arith.constant 0 : index
    %c0_16 = arith.constant 0 : index
    %34 = vector.load %arg5[%c0_14, %c0_15, %c0_16] : memref<1x1x128xf32, #tpu.memory_space<vmem>>, vector<1x1x128xf32>
    tpu.vector_store %arg5[%c0_14, %c0_15, %c0_16], %33 {strides = array<i32>} : memref<1x1x128xf32, #tpu.memory_space<vmem>>, vector<1x1x128xf32>,
    return
  }
  func.func @transform_0(%arg0: i32) -> (i32, i32) {
    %c0_i32 = arith.constant 0 : i32
    %c0_i32_0 = arith.constant 0 : i32
    return %arg0, %c0_i32 : i32, i32
  }
  func.func @transform_1(%arg0: i32) -> (i32, i32) {
    %c0_i32 = arith.constant 0 : i32
    %c0_i32_0 = arith.constant 0 : i32
    return %arg0, %c0_i32 : i32, i32
  }
  func.func @transform_2(%arg0: i32) -> (i32, i32) {
    %c0_i32 = arith.constant 0 : i32
    %c0_i32_0 = arith.constant 0 : i32
    return %arg0, %c0_i32 : i32, i32
  }
  func.func @transform_3(%arg0: i32) -> (i32, i32) {
    %c0_i32 = arith.constant 0 : i32
    %c0_i32_0 = arith.constant 0 : i32
    return %arg0, %c0_i32 : i32, i32
  }
  func.func @transform_4(%arg0: i32) -> (i32, i32, i32) {
    %c0_i32 = arith.constant 0 : i32
    %c0_i32_0 = arith.constant 0 : i32
    %c0_i32_1 = arith.constant 0 : i32
    return %arg0, %c0_i32, %c0_i32_0 : i32, i32, i32
  }
}

</mosaic_0001>

<bundles_post_ra>
// kernel: tpu_custom_call.1
= control target key start
LH: loop header
LB: loop body
LE: loop exit
PB: predicated region body
PF: predicated region fallthrough
CT: control target
= control target key end

     0   :  { %9 = vsyncpa [#allocation3], 0  ;;  %s467_s0 = inlined_call_operand.hbm [shape: f32[16,32], index: 0, kind: input, shape index: {}]   ;;  %s468_s1 = inlined_call_operand.hbm [shape: f32[16,32], index: 1, kind: input, shape index: {}]   ;;  %s469_s2 = inlined_call_operand.hbm [shape: f32[16,32], index: 2, kind: input, shape index: {}]   ;;  %s470_s3 = inlined_call_operand.hbm [shape: f32[16,32], index: 3, kind: input, shape index: {}]   ;;  %s471_s4 = inlined_call_operand.hbm [shape: f32[1,1,128], index: 4, kind: output, shape index: {}]  }
   0x1   :  { %10 = vsyncpa [#allocation6], 0 }
   0x2   :  { %11 = vsyncpa [#allocation9], 0 }
   0x3   :  { %12 = vsyncpa [#allocation4], 0  ;;  %s337_s15 = smov [#allocation5]   ;;  %s338_s17 = smov [#allocation2]  }
   0x4   :  { %s30_s16 = sshll.u32 %s337_s15, 4  ;;  %s18_s18 = sshll.u32 %s338_s17, 4  ;;  %s31_s16 = int_to_ptr.vmem [resolvable:$true] %s30_s16  ;;  %s369_s18 = int_to_ptr.vmem [resolvable:$true] %s18_s18 }
   0x5   :  { %s219_s21 = scalar_lea.hbm %s468_s1, 256 }
   0x6   :  { %p220_p0 = scmp.ne.s32.totalorder %s468_s1, %s219_s21  ;;  %p223_p1 = scmp.lt.u32.totalorder %s219_s21, %s468_s1 }
   0x8   :  { %p225_p2 = pnand %p223_p1, %p220_p0 }
   0xa   :  { %228 = shalt.err (!%p225_p2)
}
   0xb   :  { %s229_s26 = scalar_lea.vmem %s31_s16, 256  ;;  %p234_p4 = scmp.lt.s32.totalorder %s31_s16, %s31_s16 }
   0xc   :  { %p230_p3 = scmp.ne.s32.totalorder %s31_s16, %s229_s26  ;;  %p235_p5 = scmp.lt.s32.totalorder %s229_s26, %s229_s26 }
   0xe   :  { %p236_p6 = por %p235_p5, %p234_p4 }
  0x10   :  { %p237_p7 = pnand %p236_p6, %p230_p3 }
  0x12   :  { %240 = shalt.err (!%p237_p7)
}
  0x13   :  { %s339_s27 = smov 128   ;;  %s340_s28 = smov 8  }
  0x14   :  { %36 = dma.hbm_to_vmem [thread:$0]  %s468_s1, 256, %s31_s16, [#allocation6], %s339_s27, %s339_s27, %s340_s28  }
  0x15   :  { %s241_s7 = scalar_lea.hbm %s467_s0, 256 }
  0x16   :  { %p242_p8 = scmp.ne.s32.totalorder %s467_s0, %s241_s7  ;;  %p245_p9 = scmp.lt.u32.totalorder %s241_s7, %s467_s0 }
  0x18   :  { %p247_p10 = pnand %p245_p9, %p242_p8 }
  0x1a   :  { %250 = shalt.err (!%p247_p10)
}
  0x1b   :  { %s251_s12 = scalar_lea.vmem %s369_s18, 256  ;;  %p256_p12 = scmp.lt.s32.totalorder %s369_s18, %s369_s18 }
  0x1c   :  { %p252_p11 = scmp.ne.s32.totalorder %s369_s18, %s251_s12  ;;  %p257_p13 = scmp.lt.s32.totalorder %s251_s12, %s251_s12 }
  0x1e   :  { %p258_p0 = por %p257_p13, %p256_p12 }
  0x20   :  { %p259_p1 = pnand %p258_p0, %p252_p11 }
  0x22   :  { %262 = shalt.err (!%p259_p1)
}
  0x23   :  { %24 = dma.hbm_to_vmem [thread:$0]  %s467_s0, 256, %s369_s18, [#allocation3], %s339_s27, %s339_s27, %s340_s28  }
  0x24   :  { %s341_s14 = smov [#allocation7]   ;;  %s342_s16 = smov [#allocation8]  }
  0x25   :  { %s42_s15 = sshll.u32 %s341_s14, 4  ;;  %s54_s17 = sshll.u32 %s342_s16, 4  ;;  %s43_s15 = int_to_ptr.vmem [resolvable:$true] %s42_s15  ;;  %s406_s17 = int_to_ptr.vmem [resolvable:$true] %s54_s17 }
  0x26   :  { %s263_s21 = scalar_lea.hbm %s469_s2, 256 }
  0x27   :  { %p264_p2 = scmp.ne.s32.totalorder %s469_s2, %s263_s21  ;;  %p267_p3 = scmp.lt.u32.totalorder %s263_s21, %s469_s2 }
  0x29   :  { %p269_p4 = pnand %p267_p3, %p264_p2 }
  0x2b   :  { %272 = shalt.err (!%p269_p4)
}
  0x2c   :  { %s273_s0 = scalar_lea.vmem %s43_s15, 256  ;;  %p278_p6 = scmp.lt.s32.totalorder %s43_s15, %s43_s15 }
  0x2d   :  { %p274_p5 = scmp.ne.s32.totalorder %s43_s15, %s273_s0  ;;  %p279_p7 = scmp.lt.s32.totalorder %s273_s0, %s273_s0 }
  0x2f   :  { %p280_p8 = por %p279_p7, %p278_p6 }
  0x31   :  { %p281_p9 = pnand %p280_p8, %p274_p5 }
  0x33   :  { %284 = shalt.err (!%p281_p9)
}
  0x34   :  { %48 = dma.hbm_to_vmem [thread:$0]  %s469_s2, 256, %s43_s15, [#allocation6], %s339_s27, %s339_s27, %s340_s28  }
  0x35   :  { %s285_s5 = scalar_lea.hbm %s470_s3, 256 }
  0x36   :  { %p286_p10 = scmp.ne.s32.totalorder %s470_s3, %s285_s5  ;;  %p289_p11 = scmp.lt.u32.totalorder %s285_s5, %s470_s3 }
  0x38   :  { %p291_p12 = pnand %p289_p11, %p286_p10 }
  0x3a   :  { %294 = shalt.err (!%p291_p12)
}
  0x3b   :  { %s295_s10 = scalar_lea.vmem %s406_s17, 256  ;;  %p300_p0 = scmp.lt.s32.totalorder %s406_s17, %s406_s17 }
  0x3c   :  { %p296_p13 = scmp.ne.s32.totalorder %s406_s17, %s295_s10  ;;  %p301_p1 = scmp.lt.s32.totalorder %s295_s10, %s295_s10 }
  0x3e   :  { %p302_p2 = por %p301_p1, %p300_p0 }
  0x40   :  { %p303_p3 = pnand %p302_p2, %p296_p13 }
  0x42   :  { %306 = shalt.err (!%p303_p3)
}
  0x43   :  { %60 = dma.hbm_to_vmem [thread:$0]  %s470_s3, 256, %s406_s17, [#allocation9], %s339_s27, %s339_s27, %s340_s28  }
  0x44   :  { %329 = dma.done.wait [#allocation3], 256  }
  0x45   :  { %330 = vsyncadd [#allocation3], 4294967040 }
  0x46   :  { %331 = dma.done.wait [#allocation6], 512  }
  0x47   :  { %332 = vsyncadd [#allocation6], 4294966784 }
  0x48   :  { %333 = dma.done.wait [#allocation9], 256  }
  0x49   :  { %334 = vsyncadd [#allocation9], 4294967040  ;;  %vm79_vm0 = vcmask 261120   ;;  %v86_v0 = vld [vmem:[#allocation7] sm:$0xff]  ;;  %v88_v1 = vld [vmem:[#allocation8] sm:$0xff]  ;;  %vm162_vm5 = vcmask 7168  }
  0x4a   :  { %v73_v2 = vld [vmem:[#allocation2] sm:$0xff]  ;;  %v90_v3 = vmul.f32 %v88_v1, %v86_v0  ;;  %v75_v4 = vld [vmem:[#allocation5] sm:$0xff]  ;;  %v87_v5 = vld [vmem:[#allocation7 + $0x8] sm:$0xff]  ;;  %s343_s3 = smov [#allocation10]  }
  0x4b   :  { %v89_v6 = vld [vmem:[#allocation8 + $0x8] sm:$0xff]  ;;  %v77_v7 = vmul.f32 %v75_v4, %v73_v2  ;;  %v74_v9 = vld [vmem:[#allocation2 + $0x8] sm:$0xff]  ;;  %s183_s27 = sshll.u32 %s343_s3, 4  ;;  %s184_s27 = int_to_ptr.vmem [resolvable:$true] %s183_s27 }
  0x4c   :  { %v91_v8 = vmul.f32 %v89_v6, %v87_v5  ;;  %v76_v10 = vld [vmem:[#allocation5 + $0x8] sm:$0xff]  ;;  %v92_v11 = vsel %vm79_vm0, %v90_v3, 0.0  ;;  %s307_s12 = scalar_lea.vmem %s184_s27, 16  ;;  %s311_s1 = scalar_lea.vmem %s184_s27, 32 }
  0x4d   :  { %v78_v12 = vmul.f32 %v76_v10, %v74_v9  ;;  %93 = vadd.xlane.f32.xlu0 %v92_v11  ;;  %v80_v13 = vsel %vm79_vm0, %v77_v7, 0.0  ;;  %p308_p4 = scmp.ne.s32.totalorder %s184_s27, %s307_s12  ;;  %p312_p5 = scmp.lt.s32.totalorder %s184_s27, %s184_s27 }
  0x4e   :  { %81 = vadd.xlane.f32.xlu1 %v80_v13  ;;  %v95_v14 = vsel %vm79_vm0, %v91_v8, 0.0  ;;  %p313_p6 = scmp.lt.s32.totalorder %s311_s1, %s307_s12 }
  0x4f   :  { %v83_v15 = vsel %vm79_vm0, %v78_v12, 0.0 }
  0x50   :  { %p314_p7 = por %p313_p6, %p312_p5 }
  0x51   :  { %96 = vadd.xlane.f32.xlu0 %v95_v14 }
  0x52   :  { %84 = vadd.xlane.f32.xlu1 %v83_v15  ;;  %p315_p8 = pnand %p314_p7, %p308_p4 }
  0xda   :  { %v94_v16 = vpop.xlane.xlu0 %93 }
  0xdb   :  { %v128_v17 = vsub.f32 0.0, %v94_v16  ;;  %v447_v18 = vpop.xlane.xlu1 %81 }
  0xdc   :  { %v100_v19 = vand.u32 2147483647, %v447_v18  ;;  %v98_v2 = vmin.f32 %v447_v18, 0.0 }
  0xdd   :  { %v132_v20 = vand.u32 2147483647, %v128_v17  ;;  %v130_v52 = vmin.f32 %v128_v17, 0.0 }
  0xde   :  { %v102_v21 = vsub.f32 0.0, %v100_v19  ;;  %v97_v22 = vpop.xlane.xlu0 %96 }
  0xdf   :  { %v134_v23 = vsub.f32 0.0, %v132_v20  ;;  %v129_v24 = vsub.f32 0.0, %v97_v22  ;;  %v450_v25 = vpop.xlane.xlu1 %84 }
  0xe0   :  { %v104_v26 = vmul.f32 1.442695, %v102_v21  ;;  %v101_v27 = vand.u32 2147483647, %v450_v25  ;;  %v99_v7 = vmin.f32 %v450_v25, 0.0 }
  0xe1   :  { %v136_v28 = vmul.f32 1.442695, %v134_v23  ;;  %v133_v29 = vand.u32 2147483647, %v129_v24  ;;  %v131_v9 = vmin.f32 %v129_v24, 0.0 }
  0xe2   :  { %203 = vpow2.f32 %v104_v26  ;;  %v103_v30 = vsub.f32 0.0, %v101_v27 }
  0xe3   :  { %205 = vpow2.f32 %v136_v28  ;;  %v135_v31 = vsub.f32 0.0, %v133_v29 }
  0xe4   :  { %v106_v32 = vmul.f32 1.442695, %v103_v30 }
  0xe5   :  { %v138_v33 = vmul.f32 1.442695, %v135_v31 }
  0xe6   :  { %207 = vpow2.f32 %v106_v32 }
  0xe7   :  { %209 = vpow2.f32 %v138_v33 }
  0xec   :  { %v204_v34 = vpop.eup %203 }
  0xed   :  { %v206_v35 = vpop.eup %205  ;;  %v108_v36 = vadd.f32 1.0, %v204_v34  ;;  %v111_v41 = vmul.f32 -0.5, %v204_v34  ;;  %v114_v49 = vand.u32 2147483647, %v204_v34 }
  0xee   :  { %v140_v37 = vadd.f32 1.0, %v206_v35  ;;  %v143_v43 = vmul.f32 -0.5, %v206_v35  ;;  %v146_v48 = vand.u32 2147483647, %v206_v35 }
  0xef   :  { %211 = vlog2.f32 %v108_v36  ;;  %v112_v44 = vadd.f32 1.0, %v111_v41  ;;  %vm115_vm2 = vcmp.lt.f32.partialorder %v114_v49, 0.0004427343 }
  0xf0   :  { %v208_v38 = vpop.eup %207  ;;  %213 = vlog2.f32 %v140_v37  ;;  %v144_v46 = vadd.f32 1.0, %v143_v43  ;;  %vm147_vm1 = vcmp.lt.f32.partialorder %v146_v48, 0.0004427343 }
  0xf1   :  { %v210_v39 = vpop.eup %209  ;;  %v117_v40 = vadd.f32 1.0, %v208_v38  ;;  %v120_v45 = vmul.f32 -0.5, %v208_v38  ;;  %v113_v54 = vmul.f32 %v204_v34, %v112_v44  ;;  %v123_v59 = vand.u32 2147483647, %v208_v38 }
  0xf2   :  { %v149_v42 = vadd.f32 1.0, %v210_v39  ;;  %v152_v47 = vmul.f32 -0.5, %v210_v39  ;;  %v145_v57 = vmul.f32 %v206_v35, %v144_v46  ;;  %v155_v60 = vand.u32 2147483647, %v210_v39 }
  0xf3   :  { %215 = vlog2.f32 %v117_v40  ;;  %v121_v55 = vadd.f32 1.0, %v120_v45  ;;  %vm124_vm3 = vcmp.lt.f32.partialorder %v123_v59, 0.0004427343 }
  0xf4   :  { %217 = vlog2.f32 %v149_v42  ;;  %v153_v58 = vadd.f32 1.0, %v152_v47  ;;  %vm156_vm4 = vcmp.lt.f32.partialorder %v155_v60, 0.0004427343 }
  0xf5   :  { %v122_v4 = vmul.f32 %v208_v38, %v121_v55 }
  0xf6   :  { %v154_v6 = vmul.f32 %v210_v39, %v153_v58 }
  0xf9   :  { %v212_v50 = vpop.eup %211 }
  0xfa   :  { %v214_v51 = vpop.eup %213  ;;  %v110_v53 = vmul.f32 0.6931472, %v212_v50 }
  0xfb   :  { %v142_v56 = vmul.f32 0.6931472, %v214_v51 }
  0xfc   :  { %v116_v63 = vsel %vm115_vm2, %v113_v54, %v110_v53 }
  0xfd   :  { %v216_v61 = vpop.eup %215  ;;  %v148_v62 = vsel %vm147_vm1, %v145_v57, %v142_v56  ;;  %v126_v8 = vsub.f32 %v98_v2, %v116_v63 }
  0xfe   :  { %v218_v0 = vpop.eup %217  ;;  %v158_v1 = vsub.f32 %v130_v52, %v148_v62  ;;  %v119_v3 = vmul.f32 0.6931472, %v216_v61 }
  0xff   :  { %v151_v5 = vmul.f32 0.6931472, %v218_v0 }
 0x100   :  { %v125_v10 = vsel %vm124_vm3, %v122_v4, %v119_v3  ;;  %v160_v14 = vadd.f32 %v158_v1, %v126_v8 }
 0x101   :  { %v157_v11 = vsel %vm156_vm4, %v154_v6, %v151_v5  ;;  %v127_v13 = vsub.f32 %v99_v7, %v125_v10 }
 0x102   :  { %v159_v12 = vsub.f32 %v131_v9, %v157_v11  ;;  %v163_v16 = vsel %vm162_vm5, %v160_v14, 0.0 }
 0x104   :  { %v161_v15 = vadd.f32 %v159_v12, %v127_v13 }
 0x106   :  { %v164_v17 = vsel %vm162_vm5, %v161_v15, 0.0 }
 0x107   :  { %v165_v18 = vadd.f32 %v164_v17, %v163_v16 }
 0x109   :  { %166 = vadd.xlane.f32.xlu0 %v165_v18 }
 0x196   :  { %v167_v19 = vpop.xlane.xlu0 %166 }
 0x197   :  { %v168_v20 = vrot.slane %v167_v19, 4 }
 0x199   :  { %v169_v21 = vadd.f32 %v168_v20, %v167_v19 }
 0x19b   :  { %v170_v22 = vrot.slane %v169_v21, 2 }
 0x19d   :  { %v171_v23 = vadd.f32 %v170_v22, %v169_v21 }
 0x19f   :  { %v172_v25 = vrot.slane %v171_v23, 1 }
 0x1a1   :  { %v173_v26 = vadd.f32 %v172_v25, %v171_v23 }
 0x1a3   :  { %194 = vpush %v173_v26 }
 0x1d4   :  { %s195_s28 = spop %194 }
 0x1d5   :  { %v175_v24 = vstv %s195_s28 }
 0x1d6   :  { %176 = vst [vmem:[#allocation10] sm:$0x1] %v175_v24 }
 0x1d7   :  { %318 = shalt.err (!%p315_p8)
}
 0x1d8   :  { %s319_s15 = scalar_lea.hbm %s471_s4, 16 }
 0x1d9   :  { %p320_p9 = scmp.ne.s32.totalorder %s471_s4, %s319_s15  ;;  %p323_p10 = scmp.lt.u32.totalorder %s319_s15, %s471_s4 }
 0x1db   :  { %p325_p11 = pnand %p323_p10, %p320_p9 }
 0x1dd   :  { %328 = shalt.err (!%p325_p11)
}
 0x1de   :  { %186 = dma.vmem_to_hbm [thread:$0]  %s184_s27, 16, %s471_s4, [#allocation4]  }
 0x1df   :  { %335 = dma.done.wait [#allocation4], 16  }
 0x1e0   :  { %336 = vsyncadd [#allocation4], 4294967280 }
 0x1e1   :  { %190 = vsyncpa [#allocation3], 1 }
 0x1e2   :  { %191 = vsyncpa [#allocation6], 1 }
 0x1e3   :  { %192 = vsyncpa [#allocation9], 1 }
 0x1e4   :  { %193 = vsyncpa [#allocation4], 1 }

</bundles_post_ra>
